<compile_context>
chip_gen: v7x
topology: tpu7x:2x2x1
jax: 0.10.0
libtpu: 0.0.40
codegen_flags: <defaults>
</compile_context>

<pallas_src>
import functools

import jax
import jax.numpy as jnp
from jax.experimental import pallas as pl
from jax.experimental.pallas import tpu as pltpu

_LANE = 128


def _softmax_bce_kernel(out_ref, tgt_ref, part_ref, acc_ref, *,
                        L, SB, tiles_per_chunk, has_pad):
    j = pl.program_id(2)

    x = out_ref[...].astype(jnp.float32)   # (1, C, SB, 128) logits
    t = tgt_ref[...].astype(jnp.float32)   # (1, C, SB, 128) targets in [0, 1]

    # log-softmax over the channel axis (axis=1).  C is NOT a vreg axis here,
    # so these reductions are slab-wise VPU ops (no cross-sublane XLU work).
    m = jnp.max(x, axis=1, keepdims=True)            # (1, 1, SB, 128)
    z = x - m
    e = jnp.exp(z)                                   # 1 transcendental / element
    denom = jnp.sum(e, axis=1, keepdims=True)        # (1, 1, SB, 128)
    log_denom = jnp.log(denom)                       # 1 transcendental / position

    # PyTorch BCE clamps each log term at -100.
    log_p = jnp.maximum(z - log_denom, -100.0)
    log_1mp = jnp.maximum(jnp.log(denom - e) - log_denom, -100.0)  # 1 transcendental / element

    # t*log_p + (1-t)*log_1mp  with one fewer multiply; negate once at the end.
    pos = log_1mp + t * (log_p - log_1mp)            # (1, C, SB, 128)
    slab = jnp.sum(pos, axis=(0, 1))                 # (SB, 128): C-1 VPU adds / position

    if has_pad:
        # Zero out contributions from padded spatial positions (tail of last tile).
        c = pl.program_id(1)
        row0 = (c * tiles_per_chunk + j) * SB
        rows = row0 + jax.lax.broadcasted_iota(jnp.int32, (SB, _LANE), 0)
        lanes = jax.lax.broadcasted_iota(jnp.int32, (SB, _LANE), 1)
        slab = jnp.where(rows * _LANE + lanes < L, slab, 0.0)

    # Lane-slab accumulator: write on the first tile (skips a zero-fill pass),
    # add on the rest.  Pure VPU, no per-step cross-lane reduction.
    @pl.when(j == 0)
    def _():
        acc_ref[...] = slab

    @pl.when(j != 0)
    def _():
        acc_ref[...] += slab

    @pl.when(j == pl.num_programs(2) - 1)
    def _():
        part_ref[...] = (-jnp.sum(acc_ref[...])).reshape(1, 1, 1, 1)


def softmax_bce_loss(output_nchw: jax.Array, target_nchw: jax.Array) -> jax.Array:
    """output/target: (N, C, H, W). Returns scalar mean BCE(softmax(output, 1), target)."""
    N, C, H, W = output_nchw.shape
    L = H * W
    total_count = N * C * L           # BCELoss default reduction='mean' over all elements
    itemsize = jnp.dtype(output_nchw.dtype).itemsize

    # Rows of 128 lanes needed to cover the spatial axis.
    R = pl.cdiv(L, _LANE)

    # Rows per tile: per-input tile bytes = C * SB * 128 * itemsize ~ 4 MiB (exact,
    # no sublane padding thanks to the 4D repack), SB a multiple of 8.
    target_bytes = 4 * 1024 * 1024
    sb = max(8, (target_bytes // (C * _LANE * itemsize)) // 8 * 8)
    if sb >= R:
        SB = R                         # single tile; block dim == full array dim is legal
        Rp = R
    else:
        SB = sb
        Rp = pl.cdiv(R, SB) * SB       # pad rows up to a tile multiple
    Lp = Rp * _LANE
    num_tiles = Rp // SB
    has_pad = Lp != L

    # Free reshape (no transpose): channels off the minor dims, spatial on (row, lane).
    out3 = output_nchw.reshape(N, C, L)
    tgt3 = target_nchw.reshape(N, C, L)
    if has_pad:
        pad = Lp - L
        out3 = jnp.pad(out3, ((0, 0), (0, 0), (0, pad)))
        tgt3 = jnp.pad(tgt3, ((0, 0), (0, 0), (0, pad)))
    out4 = out3.reshape(N, C, Rp, _LANE)
    tgt4 = tgt3.reshape(N, C, Rp, _LANE)

    # Give v7x's second TensorCore work when the batch axis can't (N == 1).
    NC = 2 if (N == 1 and num_tiles >= 2 and num_tiles % 2 == 0) else 1
    tiles_per_chunk = num_tiles // NC
    grid = (N, NC, tiles_per_chunk)

    kernel = functools.partial(
        _softmax_bce_kernel,
        L=L, SB=SB, tiles_per_chunk=tiles_per_chunk, has_pad=has_pad,
    )

    cost = pl.CostEstimate(
        flops=12 * N * C * Lp,
        transcendentals=2 * N * C * Lp,
        bytes_accessed=2 * itemsize * N * C * Lp + 4 * N * NC,
    )

    partials = pl.pallas_call(
        kernel,
        out_shape=jax.ShapeDtypeStruct((N, NC, 1, 1), jnp.float32),
        grid_spec=pltpu.PrefetchScalarGridSpec(
            num_scalar_prefetch=0,
            grid=grid,
            in_specs=[
                pl.BlockSpec((1, C, SB, _LANE),
                             lambda n, c, j: (n, 0, c * tiles_per_chunk + j, 0)),
                pl.BlockSpec((1, C, SB, _LANE),
                             lambda n, c, j: (n, 0, c * tiles_per_chunk + j, 0)),
            ],
            out_specs=pl.BlockSpec((1, 1, 1, 1), lambda n, c, j: (n, c, 0, 0)),
            scratch_shapes=[pltpu.VMEM((SB, _LANE), jnp.float32)],
        ),
        compiler_params=pltpu.CompilerParams(
            # Batch and chunk axes can be sharded across TensorCores (v7x megacore);
            # the tile axis carries the running reduction.
            dimension_semantics=("parallel", "parallel", "arbitrary"),
            vmem_limit_bytes=48 * 1024 * 1024,
        ),
        cost_estimate=cost,
    )(out4, tgt4)

    return jnp.sum(partials) / jnp.float32(total_count)


def _reference(output_nchw, target_nchw):
    probs = jax.nn.softmax(output_nchw.astype(jnp.float32), axis=1)
    log_p = jnp.maximum(jnp.log(probs), -100.0)
    log_1mp = jnp.maximum(jnp.log(1.0 - probs), -100.0)
    t = target_nchw.astype(jnp.float32)
    return jnp.mean(-(t * log_p + (1.0 - t) * log_1mp))


if __name__ == "__main__":
    key = jax.random.PRNGKey(0)
    k1, k2 = jax.random.split(key)

    N, C, H, W = 2, 4, 16, 16
    output = jax.random.normal(k1, (N, C, H, W), dtype=jnp.float32)
    # BCE targets must lie in [0, 1]; use uniform probabilities.
    target = jax.random.uniform(k2, (N, C, H, W), dtype=jnp.float32)

    loss = jax.jit(softmax_bce_loss)(output, target)
    loss = jax.block_until_ready(loss)

    ref = _reference(output, target)
    assert jnp.allclose(loss, ref, rtol=1e-5, atol=1e-5), (loss, ref)

    print("KERNEL_OK")
</pallas_src>

<mosaic_0001>
module attributes {stable_mosaic.version = 11 : i64} {
  func.func @_softmax_bce_kernel(%arg0: i32, %arg1: i32, %arg2: i32, %arg3: memref<1x4x2x128xf32, #tpu.memory_space<vmem>>, %arg4: memref<1x4x2x128xf32, #tpu.memory_space<vmem>>, %arg5: memref<1x1x1x1xf32, #tpu.memory_space<vmem>>, %arg6: memref<2x128xf32, #tpu.memory_space<vmem>>) attributes {dimension_semantics = [#tpu.dimension_semantics<parallel>, #tpu.dimension_semantics<parallel>, #tpu.dimension_semantics<arbitrary>], iteration_bounds = array<i64: 2, 1, 1>, scalar_prefetch = 0 : i64, scratch_operands = 1 : i64, tpu.core_type = #tpu.core_type<tc>, window_params = [{transform_indices = @transform_0, window_bounds = array<i64: 1, 4, 2, 128>}, {transform_indices = @transform_1, window_bounds = array<i64: 1, 4, 2, 128>}, {transform_indices = @transform_2, window_bounds = array<i64: 1, 1, 1, 1>}]} {
    %c0 = arith.constant 0 : index
    %c0_0 = arith.constant 0 : index
    %c0_1 = arith.constant 0 : index
    %c0_2 = arith.constant 0 : index
    %0 = vector.load %arg3[%c0, %c0_0, %c0_1, %c0_2] : memref<1x4x2x128xf32, #tpu.memory_space<vmem>>, vector<1x4x2x128xf32>
    %c0_3 = arith.constant 0 : index
    %c0_4 = arith.constant 0 : index
    %c0_5 = arith.constant 0 : index
    %c0_6 = arith.constant 0 : index
    %1 = vector.load %arg4[%c0_3, %c0_4, %c0_5, %c0_6] : memref<1x4x2x128xf32, #tpu.memory_space<vmem>>, vector<1x4x2x128xf32>
    %cst = arith.constant dense<0xFF800000> : vector<1x2x128xf32>
    %2 = vector.multi_reduction <maximumf>, %0, %cst [1] : vector<1x4x2x128xf32> to vector<1x2x128xf32>
    %3 = vector.shape_cast %2 : vector<1x2x128xf32> to vector<1x1x2x128xf32>
    %4 = vector.broadcast %3 : vector<1x1x2x128xf32> to vector<1x4x2x128xf32>
    %5 = arith.subf %0, %4 : vector<1x4x2x128xf32>
    %6 = math.exp %5 : vector<1x4x2x128xf32>
    %cst_7 = arith.constant dense<0.000000e+00> : vector<1x2x128xf32>
    %7 = vector.multi_reduction <add>, %6, %cst_7 [1] : vector<1x4x2x128xf32> to vector<1x2x128xf32>
    %8 = vector.shape_cast %7 : vector<1x2x128xf32> to vector<1x1x2x128xf32>
    %9 = math.log %8 : vector<1x1x2x128xf32>
    %10 = vector.broadcast %9 : vector<1x1x2x128xf32> to vector<1x4x2x128xf32>
    %11 = arith.subf %5, %10 : vector<1x4x2x128xf32>
    %cst_8 = arith.constant -1.000000e+02 : f32
    %12 = vector.broadcast %cst_8 : f32 to vector<1x4x2x128xf32>
    %13 = arith.maximumf %11, %12 : vector<1x4x2x128xf32>
    %14 = vector.broadcast %8 : vector<1x1x2x128xf32> to vector<1x4x2x128xf32>
    %15 = arith.subf %14, %6 : vector<1x4x2x128xf32>
    %16 = math.log %15 : vector<1x4x2x128xf32>
    %17 = vector.broadcast %9 : vector<1x1x2x128xf32> to vector<1x4x2x128xf32>
    %18 = arith.subf %16, %17 : vector<1x4x2x128xf32>
    %cst_9 = arith.constant -1.000000e+02 : f32
    %19 = vector.broadcast %cst_9 : f32 to vector<1x4x2x128xf32>
    %20 = arith.maximumf %18, %19 : vector<1x4x2x128xf32>
    %21 = arith.subf %13, %20 : vector<1x4x2x128xf32>
    %22 = arith.mulf %1, %21 : vector<1x4x2x128xf32>
    %23 = arith.addf %20, %22 : vector<1x4x2x128xf32>
    %cst_10 = arith.constant dense<0.000000e+00> : vector<2x128xf32>
    %24 = vector.multi_reduction <add>, %23, %cst_10 [0, 1] : vector<1x4x2x128xf32> to vector<2x128xf32>
    %c0_i32 = arith.constant 0 : i32
    %25 = arith.cmpi eq, %arg2, %c0_i32 : i32
    %26 = arith.extui %25 : i1 to i32
    %c0_i32_11 = arith.constant 0 : i32
    %27 = arith.cmpi ne, %26, %c0_i32_11 : i32
    scf.if %27 {
      %c0_16 = arith.constant 0 : index
      %c0_17 = arith.constant 0 : index
      %34 = vector.load %arg6[%c0_16, %c0_17] : memref<2x128xf32, #tpu.memory_space<vmem>>, vector<2x128xf32>
      tpu.vector_store %arg6[%c0_16, %c0_17], %24 {strides = array<i32>} : memref<2x128xf32, #tpu.memory_space<vmem>>, vector<2x128xf32>,
    } else {
    }
    %c0_i32_12 = arith.constant 0 : i32
    %28 = arith.cmpi ne, %arg2, %c0_i32_12 : i32
    %29 = arith.extui %28 : i1 to i32
    %c0_i32_13 = arith.constant 0 : i32
    %30 = arith.cmpi ne, %29, %c0_i32_13 : i32
    scf.if %30 {
      %c0_16 = arith.constant 0 : index
      %c0_17 = arith.constant 0 : index
      %34 = vector.load %arg6[%c0_16, %c0_17] : memref<2x128xf32, #tpu.memory_space<vmem>>, vector<2x128xf32>
      %35 = arith.addf %34, %24 : vector<2x128xf32>
      %c0_18 = arith.constant 0 : index
      %c0_19 = arith.constant 0 : index
      %36 = vector.load %arg6[%c0_18, %c0_19] : memref<2x128xf32, #tpu.memory_space<vmem>>, vector<2x128xf32>
      tpu.vector_store %arg6[%c0_18, %c0_19], %35 {strides = array<i32>} : memref<2x128xf32, #tpu.memory_space<vmem>>, vector<2x128xf32>,
    } else {
    }
    %c0_i32_14 = arith.constant 0 : i32
    %31 = arith.cmpi eq, %arg2, %c0_i32_14 : i32
    %32 = arith.extui %31 : i1 to i32
    %c0_i32_15 = arith.constant 0 : i32
    %33 = arith.cmpi ne, %32, %c0_i32_15 : i32
    scf.if %33 {
      %c0_16 = arith.constant 0 : index
      %c0_17 = arith.constant 0 : index
      %34 = vector.load %arg6[%c0_16, %c0_17] : memref<2x128xf32, #tpu.memory_space<vmem>>, vector<2x128xf32>
      %35 = vector.shape_cast %34 : vector<2x128xf32> to vector<1x2x128xf32>
      %cst_18 = arith.constant dense<0.000000e+00> : vector<1xf32>
      %36 = vector.multi_reduction <add>, %35, %cst_18 [1, 2] : vector<1x2x128xf32> to vector<1xf32>
      %37 = vector.shape_cast %36 : vector<1xf32> to vector<1x1x1xf32>
      %38 = vector.extract %37[0, 0, 0] : f32 from vector<1x1x1xf32>
      %cst_19 = arith.constant 0.000000e+00 : f32
      %39 = arith.subf %cst_19, %38 : f32
      %40 = vector.broadcast %39 : f32 to vector<1x1x1x1xf32>
      %c0_20 = arith.constant 0 : index
      %c0_21 = arith.constant 0 : index
      %c0_22 = arith.constant 0 : index
      %c0_23 = arith.constant 0 : index
      %41 = vector.load %arg5[%c0_20, %c0_21, %c0_22, %c0_23] : memref<1x1x1x1xf32, #tpu.memory_space<vmem>>, vector<1x1x1x1xf32>
      tpu.vector_store %arg5[%c0_20, %c0_21, %c0_22, %c0_23], %40 {strides = array<i32>} : memref<1x1x1x1xf32, #tpu.memory_space<vmem>>, vector<1x1x1x1xf32>,
    } else {
    }
    return
  }
  func.func @transform_0(%arg0: i32, %arg1: i32, %arg2: i32) -> (i32, i32, i32, i32) {
    %c1_i32 = arith.constant 1 : i32
    %0 = arith.muli %arg1, %c1_i32 : i32
    %1 = arith.addi %0, %arg2 : i32
    %c0_i32 = arith.constant 0 : i32
    %c0_i32_0 = arith.constant 0 : i32
    %c0_i32_1 = arith.constant 0 : i32
    return %arg0, %c0_i32, %1, %c0_i32_0 : i32, i32, i32, i32
  }
  func.func @transform_1(%arg0: i32, %arg1: i32, %arg2: i32) -> (i32, i32, i32, i32) {
    %c1_i32 = arith.constant 1 : i32
    %0 = arith.muli %arg1, %c1_i32 : i32
    %1 = arith.addi %0, %arg2 : i32
    %c0_i32 = arith.constant 0 : i32
    %c0_i32_0 = arith.constant 0 : i32
    %c0_i32_1 = arith.constant 0 : i32
    return %arg0, %c0_i32, %1, %c0_i32_0 : i32, i32, i32, i32
  }
  func.func @transform_2(%arg0: i32, %arg1: i32, %arg2: i32) -> (i32, i32, i32, i32) {
    %c0_i32 = arith.constant 0 : i32
    %c0_i32_0 = arith.constant 0 : i32
    %c0_i32_1 = arith.constant 0 : i32
    return %arg0, %arg1, %c0_i32, %c0_i32_0 : i32, i32, i32, i32
  }
}

</mosaic_0001>

<bundles_post_ra>
// kernel: softmax_bce_loss.1
= control target key start
LH: loop header
LB: loop body
LE: loop exit
PB: predicated region body
PF: predicated region fallthrough
CT: control target
= control target key end

     0   :  { %s525_s9 = smov 0   ;;  %s527_s10 = smov 0   ;;  %s582_s0 = inlined_call_operand.vmem [shape: f32[2,4,2,128], index: 0, kind: input, shape index: {}]   ;;  %s583_s1 = inlined_call_operand.vmem [shape: f32[2,4,2,128], index: 1, kind: input, shape index: {}]   ;;  %s584_s2 = inlined_call_operand.vmem [shape: f32[2,1,1,1], index: 2, kind: output, shape index: {}]  }
   0x1   :  { %s529_s11 = smov 0  }
   0x2 LB: > { %s31_s12 = sadd.s32 1, %s504_s10  ;;  %p433_p0 = scmp.ge.s32.totalorder %s508_s11, 1  ;;  %s508_s11 = sphi %s529_s11, %s12_s11   ;;  %s504_s10 = sphi %s527_s10, %s586_s10   ;;  %s500_s9 = sphi %s525_s9, %s585_s9  }
   0x3   : > { %p33_p1 = scmp.ge.s32.totalorder %s31_s12, 2  ;;  %p161_p2 = scmp.lt.s32.totalorder %s508_s11, 3 }
   0x5   : > { %s588_s12 = smov (%p33_p1, %s31_s12), 0  ;;  %p162_p3 = pnand %p433_p0, %p161_p2 }
   0x6   : > { %p198_p4 = scmp.lt.s32.totalorder (!%p162_p3), %s500_s9, 1  ;;  %vm231_vm0 = vcmask (!%p162_p3), 1041408   ;;  %vm335_vm1 = vcmask (!%p162_p3), 0  }
   0x7   : > { %165 = sbr.rel (%p162_p3) target bundleno = 297 (0x129), region = 28 }
   0xe   : > { %s590_s9 = smov (!%p198_p4, %s500_s9), 1 }
   0xf   : > { %s440_s13 = sshll.u32 %s590_s9, 3  ;;  %s222_s23 = scalar_lea.vmem %s584_s2, %s590_s9 }
  0x10   : > { %s205_s16 = scalar_lea.vmem %s582_s0, %s440_s13  ;;  %s215_s19 = scalar_lea.vmem %s583_s1, %s440_s13 }
  0x11   : > { %v223_v0 = vld [vmem:[%s205_s16] sm:$0x3]  ;;  %v224_v1 = vld [vmem:[%s205_s16 + $0x2] sm:$0x3]  ;;  %v225_v2 = vld [vmem:[%s205_s16 + $0x4] sm:$0x3] }
  0x12   : > { %v226_v3 = vld [vmem:[%s205_s16 + $0x6] sm:$0x3]  ;;  %v232_v4 = vsel %vm231_vm0, %v223_v0, -inf  ;;  %v233_v5 = vsel %vm231_vm0, %v224_v1, -inf  ;;  %v234_v6 = vsel %vm231_vm0, %v225_v2, -inf }
  0x13   : > { %v235_v7 = vsel %vm231_vm0, %v226_v3, -inf  ;;  %v236_v8 = vmax.f32 %v232_v4, %v233_v5  ;;  %v227_v58 = vld [vmem:[%s215_s19] sm:$0x3]  ;;  %v228_v59 = vld [vmem:[%s215_s19 + $0x2] sm:$0x3] }
  0x14   : > { %v237_v9 = vmax.f32 %v234_v6, %v235_v7 }
  0x16   : > { %v238_v10 = vmax.f32 %v236_v8, %v237_v9 }
  0x18   : > { %v239_v11 = vsub.f32 %v223_v0, %v238_v10  ;;  %v240_v12 = vsub.f32 %v224_v1, %v238_v10  ;;  %v241_v13 = vsub.f32 %v225_v2, %v238_v10  ;;  %v242_v14 = vsub.f32 %v226_v3, %v238_v10  ;;  %v229_v0 = vld [vmem:[%s215_s19 + $0x4] sm:$0x3]  ;;  %v230_v1 = vld [vmem:[%s215_s19 + $0x6] sm:$0x3] }
  0x1a   : > { %v243_v15 = vmul.f32 1.442695, %v239_v11  ;;  %v245_v16 = vmul.f32 1.442695, %v240_v12  ;;  %v247_v17 = vmul.f32 1.442695, %v241_v13 }
  0x1b   : > { %v249_v18 = vmul.f32 1.442695, %v242_v14 }
  0x1c   : > { %468 = vpow2.f32 %v243_v15 }
  0x1d   : > { %470 = vpow2.f32 %v245_v16 }
  0x1e   : > { %472 = vpow2.f32 %v247_v17 }
  0x1f   : > { %474 = vpow2.f32 %v249_v18 }
  0x26   : > { %v469_v19 = vpop.eup %468 }
  0x27   : > { %v471_v20 = vpop.eup %470  ;;  %v251_v21 = vsel %vm231_vm0, %v469_v19, 0.0 }
  0x28   : > { %v473_v22 = vpop.eup %472  ;;  %v252_v23 = vsel %vm231_vm0, %v471_v20, 0.0 }
  0x29   : > { %v475_v24 = vpop.eup %474  ;;  %v253_v25 = vadd.f32 %v252_v23, %v251_v21  ;;  %v254_v26 = vsel %vm231_vm0, %v473_v22, 0.0 }
  0x2a   : > { %v256_v27 = vsel %vm231_vm0, %v475_v24, 0.0 }
  0x2b   : > { %v255_v28 = vadd.f32 %v254_v26, %v253_v25 }
  0x2d   : > { %v257_v29 = vadd.f32 %v256_v27, %v255_v28 }
  0x2f   : > { %476 = vlog2.f32 %v257_v29  ;;  %v268_v30 = vsub.f32 %v257_v29, %v469_v19  ;;  %v269_v31 = vsub.f32 %v257_v29, %v471_v20  ;;  %v270_v32 = vsub.f32 %v257_v29, %v473_v22 }
  0x30   : > { %v271_v33 = vsub.f32 %v257_v29, %v475_v24 }
  0x31   : > { %478 = vlog2.f32 %v268_v30 }
  0x32   : > { %480 = vlog2.f32 %v269_v31 }
  0x33   : > { %482 = vlog2.f32 %v270_v32 }
  0x34   : > { %484 = vlog2.f32 %v271_v33 }
  0x39   : > { %v477_v34 = vpop.eup %476 }
  0x3a   : > { %v259_v35 = vmul.f32 0.6931472, %v477_v34 }
  0x3b   : > { %v479_v36 = vpop.eup %478 }
  0x3c   : > { %v481_v37 = vpop.eup %480  ;;  %v260_v38 = vsub.f32 %v239_v11, %v259_v35  ;;  %v261_v39 = vsub.f32 %v240_v12, %v259_v35  ;;  %v262_v40 = vsub.f32 %v241_v13, %v259_v35  ;;  %v263_v41 = vsub.f32 %v242_v14, %v259_v35 }
  0x3d   : > { %v483_v42 = vpop.eup %482  ;;  %v273_v43 = vmul.f32 0.6931472, %v479_v36  ;;  %v275_v44 = vmul.f32 0.6931472, %v481_v37 }
  0x3e   : > { %v485_v45 = vpop.eup %484  ;;  %v264_v46 = vmax.f32 %v260_v38, -100.0  ;;  %v265_v47 = vmax.f32 %v261_v39, -100.0  ;;  %v277_v48 = vmul.f32 0.6931472, %v483_v42  ;;  %v266_v52 = vmax.f32 %v262_v40, -100.0 }
  0x3f   : > { %v279_v49 = vmul.f32 0.6931472, %v485_v45  ;;  %v280_v50 = vsub.f32 %v273_v43, %v259_v35  ;;  %v281_v51 = vsub.f32 %v275_v44, %v259_v35  ;;  %v267_v53 = vmax.f32 %v263_v41, -100.0 }
  0x40   : > { %v282_v54 = vsub.f32 %v277_v48, %v259_v35 }
  0x41   : > { %v283_v55 = vsub.f32 %v279_v49, %v259_v35  ;;  %v284_v56 = vmax.f32 %v280_v50, -100.0  ;;  %v285_v57 = vmax.f32 %v281_v51, -100.0 }
  0x42   : > { %v286_v60 = vmax.f32 %v282_v54, -100.0 }
  0x43   : > { %v287_v61 = vmax.f32 %v283_v55, -100.0  ;;  %v288_v62 = vsub.f32 %v264_v46, %v284_v56  ;;  %v289_v63 = vsub.f32 %v265_v47, %v285_v57 }
  0x44   : > { %v290_v2 = vsub.f32 %v266_v52, %v286_v60 }
  0x45   : > { %v291_v3 = vsub.f32 %v267_v53, %v287_v61  ;;  %v292_v4 = vmul.f32 %v288_v62, %v227_v58  ;;  %v293_v5 = vmul.f32 %v289_v63, %v228_v59 }
  0x46   : > { %v294_v6 = vmul.f32 %v290_v2, %v229_v0 }
  0x47   : > { %v295_v7 = vmul.f32 %v291_v3, %v230_v1  ;;  %v296_v8 = vadd.f32 %v292_v4, %v284_v56  ;;  %v297_v9 = vadd.f32 %v293_v5, %v285_v57 }
  0x48   : > { %v298_v10 = vadd.f32 %v294_v6, %v286_v60 }
  0x49   : > { %v299_v11 = vadd.f32 %v295_v7, %v287_v61  ;;  %v300_v12 = vsel %vm231_vm0, %v296_v8, 0.0  ;;  %v301_v13 = vsel %vm231_vm0, %v297_v9, 0.0 }
  0x4a   : > { %v302_v14 = vadd.f32 %v301_v13, %v300_v12  ;;  %v303_v15 = vsel %vm231_vm0, %v298_v10, 0.0 }
  0x4b   : > { %v305_v16 = vsel %vm231_vm0, %v299_v11, 0.0 }
  0x4c   : > { %v304_v17 = vadd.f32 %v303_v15, %v302_v14 }
  0x4e   : > { %v306_v18 = vadd.f32 %v305_v16, %v304_v17 }
  0x50   : > { %311 = vst [vmem:[#allocation2] sm:$0x3] %v306_v18 }
  0x57   : > { %v322_v19 = vld [vmem:[#allocation2] sm:$0x3] }
  0x58   : > { %v323_v20 = vsel %vm231_vm0, %v322_v19, 0.0 }
  0x59   : > { %324 = vadd.xlane.f32.xlu0 %v323_v20 }
  0xe6   : > { %v325_v21 = vpop.xlane.xlu0 %324 }
  0xe7   : > { %v326_v22 = vrot.slane %v325_v21, 4 }
  0xe9   : > { %v327_v23 = vadd.f32 %v326_v22, %v325_v21 }
  0xeb   : > { %v328_v24 = vrot.slane %v327_v23, 2 }
  0xed   : > { %v329_v25 = vadd.f32 %v328_v24, %v327_v23 }
  0xef   : > { %v330_v26 = vrot.slane %v329_v25, 1 }
  0xf1   : > { %v331_v27 = vadd.f32 %v330_v26, %v329_v25 }
  0xf3   : > { %442 = vpush %v331_v27 }
 0x124   : > { %s443_s20 = spop %442 }
 0x125   : > { %s333_s24 = ssub.f32 0.0, %s443_s20 }
 0x127   : > { %v334_v28 = vstv %s333_s24 }
 0x128   : > { %336 = vst.msk [vmem:[%s222_s23] sm:$0x1] %vm335_vm1, %v334_v28 }
 0x129 PF: > { %s12_s11 = sadd.s32 1, %s508_s11   ;;  %s585_s9 = smov %s504_s10 }
 0x12a   : > { %p9_p5 = scmp.ge.s32.totalorder %s12_s11, 4   ;;  %s586_s10 = smov %s588_s12 }
 0x12c   :  { %11 = sbr.rel (!%p9_p5) target bundleno = 2 (0x2), region = 73 }

</bundles_post_ra>
